<compile_context>
chip_gen: v7x
topology: tpu7x:2x2x1
jax: 0.10.0
libtpu: 0.0.40
codegen_flags: <defaults>
</compile_context>

<pallas_src>
import jax
import jax.numpy as jnp
from jax.experimental import pallas as pl
from jax.experimental.pallas import tpu as pltpu

_MiB = 1 << 20


def _round_up(n, m):
    return ((n + m - 1) // m) * m


def _cdiv(a, b):
    return (a + b - 1) // b


def _vmem_budgets():
    """Per-generation (tile_budget, vmem_limit_bytes)."""
    try:
        cap = int(pltpu.get_tpu_info().vmem_capacity_bytes)
    except Exception:
        cap = 64 * _MiB  # conservative (v7x-sized) fallback
    if cap >= 128 * _MiB:
        # v5e / v6e: 128 MiB physical.  Default scoped limit is only 16/32 MiB,
        # so we must (and do) set vmem_limit_bytes explicitly.
        tile_budget = 96 * _MiB
        vmem_limit = 112 * _MiB
    else:
        # v7x: 64 MiB per TensorCore -> leave compiler scratch headroom.
        tile_budget = max(16 * _MiB, cap - 16 * _MiB)   # 48 MiB on v7x
        vmem_limit = max(tile_budget, cap - 8 * _MiB)   # 56 MiB on v7x
    return tile_budget, vmem_limit


def _gml_kernel(g_ref, x_ref, w_ref, o_ref):
    # g_ref: (Bblk, M, M)  x_ref: (Bblk, M, C)  w_ref: (C, P)  o_ref: (Bblk, M, P)
    x = x_ref[...]
    w = w_ref[...]
    g = g_ref[...]
    # Per-channel projection: (Bblk, M, C) @ (C, P) -> (Bblk, M, P), f32 accumulate.
    y = jax.lax.dot_general(
        x, w, (((2,), (0,)), ((), ())), preferred_element_type=jnp.float32)
    # Graph aggregation, batched over Bblk: z[b,k,p] = sum_l g[b,k,l] * y[b,l,p].
    # y is cast back to the operand dtype for full MXU rate; accumulation is f32.
    z = jax.lax.dot_general(
        g, y.astype(g.dtype), (((2,), (1,)), ((0,), (0,))),
        preferred_element_type=jnp.float32)
    # LeakyReLU (negative_slope = 0.01), computed in f32.
    o_ref[...] = jnp.where(z > 0, z, 0.01 * z).astype(o_ref.dtype)


def graph_mat_layer_fast(G, x, W, *, operand_dtype=jnp.bfloat16,
                         out_dtype=jnp.float32, m_pad_multiple=8):
    """
    G: (B, GS, M, M) adjacency stack.
    x: (B, M, C)     node features.
    W: (GS, C, P)    per-channel linear weights (torch weight (P,C), pre-transposed).
    operand_dtype:   matmul operand dtype (bf16 default; pass jnp.float32 for
                     bit-accurate numerics, e.g. with tiny noise-scaled weights).
    out_dtype:       output dtype (f32 default; bf16 halves HBM writeback).
    Returns (GS, B, M, P) = LeakyReLU(einsum('ijkl,jilm->jikm', G, x@W)).
    agg_func is None in this configuration (no reduction over GS).
    """
    B, GS, M, _ = G.shape
    C = x.shape[-1]
    P = W.shape[-1]

    if operand_dtype is not None:
        G = G.astype(operand_dtype)
        x = x.astype(operand_dtype)
        W = W.astype(operand_dtype)

    in_bytes = jnp.dtype(G.dtype).itemsize
    out_bytes = jnp.dtype(out_dtype).itemsize

    # Pad to TPU tiling: lane (last) dims to 128, sublane dim (M) to >=8.
    M_pad = _round_up(M, m_pad_multiple)
    C_pad = _round_up(C, 128)
    P_pad = _round_up(P, 128)

    # Batch-block size: keep double-buffered per-step VMEM under the
    # per-generation tile budget; no arbitrary cap beyond that.
    tile_budget, vmem_limit = _vmem_budgets()
    per_b = (M_pad * M_pad + M_pad * C_pad) * in_bytes + M_pad * P_pad * out_bytes
    fixed = C_pad * P_pad * in_bytes  # weight tile
    b_blk_max = int(max(1, (tile_budget // 2 - fixed) // max(per_b, 1)))
    b_blk_max = max(1, min(B, b_blk_max))
    n_bb = _cdiv(B, b_blk_max)
    b_blk = _cdiv(B, n_bb)          # balanced blocks -> at most one short tail
    B_pad = n_bb * b_blk

    # Zero-padding keeps the math exact; padded rows/cols are sliced off below.
    G_p = jnp.pad(G, ((0, B_pad - B), (0, 0), (0, M_pad - M), (0, M_pad - M)))
    x_p = jnp.pad(x, ((0, B_pad - B), (0, M_pad - M), (0, C_pad - C)))
    W_p = jnp.pad(W, ((0, 0), (0, C_pad - C), (0, P_pad - P)))

    flops = 2 * B_pad * GS * (M_pad * C_pad * P_pad + M_pad * M_pad * P_pad)
    bytes_accessed = (
        (G_p.size + x_p.size + W_p.size) * in_bytes
        + GS * B_pad * M_pad * P_pad * out_bytes
    )

    # Megacore: split on the batch-block axis when possible so each core works
    # on disjoint G/x slabs (x stays resident along the inner GS axis).
    if n_bb >= 2:
        dim_sem = ("parallel", "arbitrary")
    else:
        dim_sem = ("parallel", "parallel")

    out = pl.pallas_call(
        _gml_kernel,
        out_shape=jax.ShapeDtypeStruct((GS, B_pad, M_pad, P_pad), out_dtype),
        grid_spec=pltpu.PrefetchScalarGridSpec(
            num_scalar_prefetch=0,
            grid=(n_bb, GS),  # GS innermost -> x block resident across channels
            in_specs=[
                # G[bb-block, g, :, :] -> (Bblk, M_pad, M_pad)
                pl.BlockSpec((b_blk, None, M_pad, M_pad),
                             lambda bb, g: (bb, g, 0, 0)),
                # x[bb-block, :, :] -> (Bblk, M_pad, C_pad); invariant along g.
                pl.BlockSpec((b_blk, M_pad, C_pad),
                             lambda bb, g: (bb, 0, 0)),
                # W[g, :, :] -> (C_pad, P_pad)
                pl.BlockSpec((None, C_pad, P_pad),
                             lambda bb, g: (g, 0, 0)),
            ],
            out_specs=pl.BlockSpec((None, b_blk, M_pad, P_pad),
                                   lambda bb, g: (g, bb, 0, 0)),
        ),
        compiler_params=pltpu.CompilerParams(
            dimension_semantics=dim_sem,
            vmem_limit_bytes=int(vmem_limit)),
        cost_estimate=pl.CostEstimate(
            flops=int(flops), transcendentals=0,
            bytes_accessed=int(bytes_accessed)),
    )(G_p, x_p, W_p)

    return out[:, :B, :M, :P]


if __name__ == "__main__":
    # Small shapes consistent with the module's forward.
    B, GS, M, C, P = 2, 2, 16, 32, 16
    noise = 1e-6  # module default: weight ~ Normal(0, noise), no bias

    key = jax.random.PRNGKey(0)
    kg, kx, kw = jax.random.split(key, 3)

    G = jax.random.uniform(kg, (B, GS, M, M), dtype=jnp.float32)
    x = jax.random.normal(kx, (B, M, C), dtype=jnp.float32)
    # torch Linear weight is (P, C); store transposed (C, P) per channel.
    W = noise * jax.random.normal(kw, (GS, C, P), dtype=jnp.float32)

    # Pure-JAX reference (torch einsum 'ijkl,jilm->jikm' + LeakyReLU).
    multi_x = jnp.einsum("bmc,gcp->gbmp", x, W)
    ref = jnp.einsum("bgkl,gblp->gbkp", G, multi_x)
    ref = jnp.where(ref > 0, ref, 0.01 * ref)

    # 1) f32 operand path: strict numerical check against the reference.
    out_f32 = jax.block_until_ready(
        graph_mat_layer_fast(G, x, W, operand_dtype=jnp.float32))
    assert out_f32.shape == (GS, B, M, P)
    assert jnp.allclose(out_f32, ref, atol=1e-6, rtol=1e-5), float(
        jnp.max(jnp.abs(out_f32 - ref)))

    # 2) Default (bf16 operand) production path: loose relative check, since
    #    the noise=1e-6-scaled weights and the bf16 cast of the intermediate y
    #    limit agreement with the f32 reference to a few percent.
    out_bf = jax.block_until_ready(graph_mat_layer_fast(G, x, W))
    assert out_bf.shape == (GS, B, M, P)
    scale = float(jnp.max(jnp.abs(ref)))
    assert jnp.allclose(out_bf.astype(jnp.float32), ref,
                        rtol=0.08, atol=0.05 * scale), float(
        jnp.max(jnp.abs(out_bf.astype(jnp.float32) - ref)))

    print("KERNEL_OK")
</pallas_src>

<mosaic_0001>
module attributes {stable_mosaic.version = 11 : i64} {
  func.func @_gml_kernel(%arg0: i32, %arg1: i32, %arg2: memref<2x1x16x16xf32, #tpu.memory_space<vmem>>, %arg3: memref<2x16x128xf32, #tpu.memory_space<vmem>>, %arg4: memref<1x128x128xf32, #tpu.memory_space<vmem>>, %arg5: memref<1x2x16x128xf32, #tpu.memory_space<vmem>>) attributes {dimension_semantics = [#tpu.dimension_semantics<parallel>, #tpu.dimension_semantics<parallel>], iteration_bounds = array<i64: 1, 2>, scalar_prefetch = 0 : i64, scratch_operands = 0 : i64, tpu.core_type = #tpu.core_type<tc>, window_params = [{transform_indices = @transform_0, window_bounds = array<i64: 2, 1, 16, 16>}, {transform_indices = @transform_1, window_bounds = array<i64: 2, 16, 128>}, {transform_indices = @transform_2, window_bounds = array<i64: 1, 128, 128>}, {transform_indices = @transform_3, window_bounds = array<i64: 1, 2, 16, 128>}]} {
    %c0 = arith.constant 0 : index
    %c0_0 = arith.constant 0 : index
    %c0_1 = arith.constant 0 : index
    %0 = vector.load %arg3[%c0, %c0_0, %c0_1] : memref<2x16x128xf32, #tpu.memory_space<vmem>>, vector<2x16x128xf32>
    %c0_2 = arith.constant 0 : index
    %c0_3 = arith.constant 0 : index
    %c0_4 = arith.constant 0 : index
    %1 = vector.load %arg4[%c0_2, %c0_3, %c0_4] : memref<1x128x128xf32, #tpu.memory_space<vmem>>, vector<1x128x128xf32>
    %2 = vector.shape_cast %1 : vector<1x128x128xf32> to vector<128x128xf32>
    %c0_5 = arith.constant 0 : index
    %c0_6 = arith.constant 0 : index
    %c0_7 = arith.constant 0 : index
    %c0_8 = arith.constant 0 : index
    %3 = vector.load %arg2[%c0_5, %c0_6, %c0_7, %c0_8] : memref<2x1x16x16xf32, #tpu.memory_space<vmem>>, vector<2x1x16x16xf32>
    %4 = vector.shape_cast %3 : vector<2x1x16x16xf32> to vector<2x16x16xf32>
    %cst = arith.constant dense<0.000000e+00> : vector<2x16x128xf32>
    %5 = tpu.matmul %0, %2, %cst {dimension_numbers = #tpu.dot_dimension_numbers<[2], [0], [0, 1], [1], [0, 0, 0, 1, 1, 1], [], []>} : vector<2x16x128xf32>, vector<128x128xf32>, vector<2x16x128xf32> -> vector<2x16x128xf32>
    %cst_9 = arith.constant dense<0.000000e+00> : vector<2x16x128xf32>
    %6 = tpu.matmul %4, %5, %cst_9 {dimension_numbers = #tpu.dot_dimension_numbers<[2], [1], [1], [2], [0, 0, 0, 1, 1, 2], [0], [0]>} : vector<2x16x16xf32>, vector<2x16x128xf32>, vector<2x16x128xf32> -> vector<2x16x128xf32>
    %cst_10 = arith.constant 0.000000e+00 : f32
    %7 = vector.broadcast %cst_10 : f32 to vector<2x16x128xf32>
    %8 = arith.cmpf ogt, %6, %7 : vector<2x16x128xf32>
    %cst_11 = arith.constant 0.00999999977 : f32
    %9 = vector.broadcast %cst_11 : f32 to vector<2x16x128xf32>
    %10 = arith.mulf %9, %6 : vector<2x16x128xf32>
    %11 = arith.select %8, %6, %10 : vector<2x16x128xi1>, vector<2x16x128xf32>
    %c0_12 = arith.constant 0 : index
    %c0_13 = arith.constant 0 : index
    %c0_14 = arith.constant 0 : index
    %c0_15 = arith.constant 0 : index
    %12 = vector.load %arg5[%c0_12, %c0_13, %c0_14, %c0_15] : memref<1x2x16x128xf32, #tpu.memory_space<vmem>>, vector<1x2x16x128xf32>
    %13 = vector.shape_cast %12 : vector<1x2x16x128xf32> to vector<2x16x128xf32>
    %14 = vector.shape_cast %11 : vector<2x16x128xf32> to vector<1x2x16x128xf32>
    tpu.vector_store %arg5[%c0_12, %c0_13, %c0_14, %c0_15], %14 {strides = array<i32>} : memref<1x2x16x128xf32, #tpu.memory_space<vmem>>, vector<1x2x16x128xf32>,
    return
  }
  func.func @transform_0(%arg0: i32, %arg1: i32) -> (i32, i32, i32, i32) {
    %c0_i32 = arith.constant 0 : i32
    %c0_i32_0 = arith.constant 0 : i32
    %c0_i32_1 = arith.constant 0 : i32
    return %arg0, %arg1, %c0_i32, %c0_i32_0 : i32, i32, i32, i32
  }
  func.func @transform_1(%arg0: i32, %arg1: i32) -> (i32, i32, i32) {
    %c0_i32 = arith.constant 0 : i32
    %c0_i32_0 = arith.constant 0 : i32
    %c0_i32_1 = arith.constant 0 : i32
    return %arg0, %c0_i32, %c0_i32_0 : i32, i32, i32
  }
  func.func @transform_2(%arg0: i32, %arg1: i32) -> (i32, i32, i32) {
    %c0_i32 = arith.constant 0 : i32
    %c0_i32_0 = arith.constant 0 : i32
    %c0_i32_1 = arith.constant 0 : i32
    return %arg1, %c0_i32, %c0_i32_0 : i32, i32, i32
  }
  func.func @transform_3(%arg0: i32, %arg1: i32) -> (i32, i32, i32, i32) {
    %c0_i32 = arith.constant 0 : i32
    %c0_i32_0 = arith.constant 0 : i32
    %c0_i32_1 = arith.constant 0 : i32
    return %arg1, %arg0, %c0_i32, %c0_i32_0 : i32, i32, i32, i32
  }
}

</mosaic_0001>

<bundles_post_ra>
// kernel: tpu_custom_call.1
= control target key start
LH: loop header
LB: loop body
LE: loop exit
PB: predicated region body
PF: predicated region fallthrough
CT: control target
= control target key end

     0   :  { %s1406_s0 = inlined_call_operand.hbm [shape: f32[2,2,16,16], index: 0, kind: input, shape index: {}]   ;;  %s1407_s1 = inlined_call_operand.hbm [shape: f32[2,16,128], index: 1, kind: input, shape index: {}]   ;;  %s1408_s2 = inlined_call_operand.hbm [shape: f32[2,128,128], index: 2, kind: input, shape index: {}]   ;;  %s1409_s3 = inlined_call_operand.hbm [shape: f32[2,2,16,128], index: 3, kind: output, shape index: {}]  }
   0x1   :  { %1416 = sst [smem:[#allocation17_spill]] %s1406_s0 }
   0x2   :  { %1417 = sst [smem:[#allocation18_spill]] %s1407_s1 }
   0x3   :  { %8 = vsyncpa [#allocation3], 0 }
   0x4   :  { %10 = vsyncpa [#allocation3 + $0x1], 0 }
   0x5   :  { %11 = vsyncpa [#allocation6], 0 }
   0x6   :  { %12 = vsyncpa [#allocation4], 0 }
   0x7   :  { %14 = vsyncpa [#allocation4 + $0x1], 0  ;;  %s1143_s12 = smov 0   ;;  %s1145_s13 = smov 0  }
   0x8   :  { %s1147_s14 = smov 0   ;;  %s1149_s15 = smov 0  }
   0x9   :  { %s1151_s16 = smov 0   ;;  %s1153_s17 = smov 0  }
   0xa LB: > { %s1174_s18 = sadd.s32 4294967295, %s1106_s17   ;;  %s722_s19 = sadd.s32 4294967294, %s1106_s17   ;;  %s1106_s17 = sphi %s1153_s17, %s20_s17   ;;  %s1102_s16 = sphi %s1151_s16, %s1439_s16   ;;  %s1098_s15 = sphi %s1149_s15, %s1438_s15   ;;  %s1094_s14 = sphi %s1147_s14, %s1437_s14   ;;  %s1090_s13 = sphi %s1145_s13, %s1436_s13   ;;  %s1086_s12 = sphi %s1143_s12, %s1435_s12  }
   0xb   : > { %s29_s20 = sadd.s32 1, %s1102_s16  ;;  %s41_s21 = sadd.s32 1, %s1094_s14 }
   0xc   : > { %p30_p0 = scmp.ge.s32.totalorder %s29_s20, 2  ;;  %p48_p1 = scmp.ne.s32.totalorder %s1094_s14, %s1090_s13 }
   0xd   : > { %p49_p2 = scmp.eq.s32.totalorder %s1106_s17, 0  ;;  %p54_p3 = scmp.ne.s32.totalorder %s1090_s13, %s1086_s12 }
   0xe   : > { %s1441_s20 = smov (%p30_p0, %s29_s20), 0  ;;  %p1410_p5 = scmp.eq.s32.totalorder %s1174_s18, 0 }
   0xf   : > { %1418 = sst [smem:[#allocation16_spill]] %s1441_s20  ;;  %p1186_p4 = por %p49_p2, %p48_p1 }
  0x10   : > { %s37_s23 = ssub.s32 %s1102_s16, %s1441_s20  ;;  %p132_p6 = scmp.eq.s32.totalorder %s1174_s18, 1 }
  0x11   : > { %s1419_s22 = scalar_select %p1186_p4, 1, 0 }
  0x12   : > { %p39_p7 = scmp.eq.s32.totalorder %s37_s23, 0  ;;  %p1196_p8 = por %p1410_p5, %p54_p3 }
  0x13   : > { %p1200_p9 = por %p132_p6, %p48_p1  ;;  %p138_p10 = scmp.eq.s32.totalorder %s722_s19, 1 }
  0x14   : > { %s1420_s24 = scalar_select %p1196_p8, 1, 0 }
  0x15   : > { %s1421_s25 = scalar_select %p1200_p9, 1, 0 }
  0x16   : > { %s1205_s26 = scalar_select %p39_p7, %s1094_s14, %s41_s21  }
  0x17   : > { %p1207_p11 = por %p138_p10, %p54_p3  ;;  %p723_p12 = scmp.ge.s32.totalorder %s1106_s17, 1 }
  0x18   : > { %p145_p13 = scmp.lt.s32.totalorder %s1106_s17, 3  ;;  %s1108_s29 = smov [#allocation5]  }
  0x19   : > { %s1422_s27 = scalar_select %p1207_p11, 1, 0 }
  0x1a   : > { %p1213_p0 = pnand %p723_p12, %p145_p13  ;;  %s161_s30 = sshll.u32 %s1108_s29, 4  ;;  %s162_s30 = int_to_ptr.vmem [resolvable:$true] %s161_s30 }
  0x1b   : > { %s1425_s1 = sld [smem:[#allocation18_spill]] }
  0x1c   : > { %s1423_s28 = scalar_select %p1213_p0, 1, 0 }
  0x1d   : > { %p888_p1 = pneg %p1213_p0 }
  0x1f   : > { %p1221_p2 = pnand %p888_p1, %p1410_p5 }
  0x21   : > { %s960_s7 = scalar_lea.hbm %s1425_s1, 512  ;;  %p962_p6 = pneg %p1221_p2 }
  0x22   : > { %p961_p3 = scmp.ne.s32.totalorder %s1425_s1, %s960_s7  ;;  %p967_p12 = scmp.lt.u32.totalorder %s960_s7, %s1425_s1 }
  0x24   : > { %p963_p7 = pnand %p962_p6, %p961_p3 }
  0x26   : > { %p964_p10 = pneg %p963_p7 }
  0x28   : > { %p969_p13 = pnand %p967_p12, %p964_p10 }
  0x2a   : > { %972 = shalt.err (!%p969_p13)
}
  0x2b   : > { %s973_s19 = scalar_lea.vmem %s162_s30, 512  ;;  %p981_p9 = scmp.lt.s32.totalorder %s162_s30, %s162_s30 }
  0x2c   : > { %p974_p1 = scmp.ne.s32.totalorder %s162_s30, %s973_s19  ;;  %p982_p8 = scmp.lt.s32.totalorder %s973_s19, %s973_s19 }
  0x2e   : > { %p976_p5 = pnand %p974_p1, %p962_p6  ;;  %p983_p0 = por %p982_p8, %p981_p9 }
  0x30   : > { %p977_p11 = pneg %p976_p5 }
  0x32   : > { %p984_p4 = pnand %p983_p0, %p977_p11 }
  0x34   : > { %987 = shalt.err (!%p984_p4)
}
  0x35   : > { %s1109_s21 = smov 128   ;;  %s1110_s23 = smov 8  }
  0x36   : > { %891 = dma.hbm_to_vmem [thread:$0]  (!%p1221_p2), %s1425_s1, 512, %s162_s30, [#allocation6], %s1109_s21, %s1109_s21, %s1110_s23  }
  0x37   : > { %p725_p3 = scmp.ge.s32.totalorder %s1106_s17, 2 }
  0x39   : > { %171 = sbr.rel (%p725_p3) target bundleno = 104 (0x68), region = 20 }
  0x40   : > { %s175_s6 = sand.u32 1, %s1106_s17   ;;  %s177_s7 = sand.u32 1, %s1094_s14  }
  0x41   : > { %s726_s4 = sshll.u32 %s177_s7, 5  ;;  %s748_s8 = sshll.u32 %s1102_s16, 8 }
  0x42   : > { %s1426_s0 = sld [smem:[#allocation17_spill]]  ;;  %p1427_p4 = scmp.ne.s32.totalorder %s1419_s22, 0 }
  0x43   : > { %s179_s19 = scalar_lea.vmem [#allocation2], %s726_s4  ;;  %s1111_s29 = smov 512  }
  0x44   : > { %s873_s11 = scalar_select %p1427_p4, [#allocation0], [#allocation11] }
  0x45   : > { %s201_s21 = sshll.u32 %s179_s19, 4  ;;  %874 = sst [smem:[#allocation10]] (%p1427_p4), %s1111_s29  ;;  %s202_s21 = int_to_ptr.vmem [resolvable:$true] %s201_s21 }
  0x46   : > { %s193_s23 = sld [smem:[%s873_s11]]   ;;  %s1112_s5 = smov 256  }
  0x47   : > { %875 = sst [smem:[#allocation10 + $0x1]] (%p1427_p4), %s1112_s5  ;;  %s1113_s1 = smov 2  }
  0x48   : > { %s188_s10 = scalar_lea.hbm %s1426_s0, %s748_s8  ;;  %876 = sst [smem:[#allocation10 + $0x2]] (%p1427_p4), %s1113_s1 }
  0x49   : > { %s1114_s20 = smov 128   ;;  %s1115_s4 = smov 8  }
  0x4a   : > { %877 = sst [smem:[#allocation10 + $0x3]] (%p1427_p4), %s1114_s20  ;;  %s1264_s30 = scalar_lea.sflag [#allocation3], %s175_s6 }
  0x4b   : > { %878 = sst [smem:[#allocation10 + $0x4]] (%p1427_p4), %s1114_s20  ;;  %s1116_s11 = smov [#allocation9]  }
  0x4c   : > { %s729_s8 = sshll.u32 %s193_s23, 26  ;;  %879 = sst [smem:[#allocation10 + $0x5]] (%p1427_p4), %s1115_s4 }
  0x4d   : > { %s730_s9 = sadd.s32 134217728, %s729_s8  ;;  %s731_s19 = sshll.u32 %s177_s7, 7 }
  0x4e   : > { %880 = dma.general (%p1427_p4), %s188_s10, 512, %s202_s21, %s1264_s30, %s1116_s11, [#allocation10], %s730_s9, 0  }
  0x4f   : > { %s749_s1 = sshll.u32 %s1102_s16, 11  ;;  %s228_s20 = scalar_lea.vmem [#allocation7], %s731_s19 }
  0x50   : > { %s1273_s0 = scalar_lea.hbm %s1408_s2, %s749_s1  ;;  %s235_s6 = sshll.u32 %s228_s20, 4  ;;  %s1275_s6 = int_to_ptr.vmem [resolvable:$true] %s235_s6 }
  0x51   : > { %s988_s23 = scalar_lea.hbm %s1273_s0, 2048  ;;  %s992_s21 = scalar_lea.hbm %s1408_s2, 4096 }
  0x52   : > { %p989_p5 = scmp.ne.s32.totalorder %s1273_s0, %s988_s23  ;;  %p993_p11 = scmp.lt.u32.totalorder %s1273_s0, %s1408_s2 }
  0x53   : > { %p994_p0 = scmp.lt.u32.totalorder %s992_s21, %s988_s23  ;;  %p996_p6 = scmp.lt.u32.totalorder %s988_s23, %s1273_s0 }
  0x54   : > { %p990_p8 = pnand %p989_p5, %p1427_p4 }
  0x55   : > { %p995_p2 = por %p994_p0, %p993_p11 }
  0x56   : > { %p991_p9 = pneg %p990_p8 }
  0x57   : > { %p997_p7 = por %p996_p6, %p995_p2 }
  0x59   : > { %p998_p10 = pnand %p997_p7, %p991_p9 }
  0x5b   : > { %1001 = shalt.err (!%p998_p10)
}
  0x5c   : > { %s1002_s9 = scalar_lea.vmem %s1275_s6, 2048  ;;  %s1117_s11 = smov [#allocation7]  }
  0x5d   : > { %p1003_p12 = scmp.ne.s32.totalorder %s1275_s6, %s1002_s9  ;;  %s1006_s19 = sshll.u32 %s1117_s11, 4  ;;  %s1007_s19 = int_to_ptr.vmem [resolvable:$false] %s1006_s19 }
  0x5e   : > { %s1008_s1 = scalar_lea.vmem %s1007_s19, 4096  ;;  %p1009_p5 = scmp.lt.s32.totalorder %s1275_s6, %s1007_s19 }
  0x5f   : > { %p1004_p13 = pnand %p1003_p12, %p1427_p4  ;;  %p1010_p8 = scmp.lt.s32.totalorder %s1008_s1, %s1002_s9 }
  0x61   : > { %p1005_p1 = pneg %p1004_p13  ;;  %p1011_p11 = por %p1010_p8, %p1009_p5 }
  0x63   : > { %p1012_p0 = pnand %p1011_p11, %p1005_p1 }
  0x65   : > { %1015 = shalt.err (!%p1012_p0)
}
  0x66   : > { %s1118_s29 = smov 128   ;;  %s1119_s5 = smov 8  }
  0x67   : > { %881 = dma.hbm_to_vmem [thread:$0]  (%p1427_p4), %s1273_s0, 2048, %s1275_s6, %s1264_s30, %s1118_s29, %s1118_s29, %s1119_s5  }
  0x68 PF: > { %p1428_p9 = scmp.ne.s32.totalorder %s1423_s28, 0 }
  0x69   : > { %s249_s20 = sand.u32 (!%p1428_p9), 1, %s1174_s18   ;;  %s1303_s23 = sand.u32 (!%p1428_p9), 1, %s1090_s13  }
  0x6a   : > { %247 = sbr.rel (%p1428_p9) target bundleno = 609 (0x261), region = 32  ;;  %s735_s7 = sshll.u32 (!%p1428_p9), %s1303_s23, 5 }
  0x6b   : > { %s250_s10 = scalar_lea.sflag (!%p1428_p9), [#allocation3], %s249_s20  ;;  %s1308_s21 = scalar_lea.vmem (!%p1428_p9), [#allocation2], %s735_s7 }
  0x6c   : > { %p1429_p2 = scmp.ne.s32.totalorder (!%p1428_p9), %s1420_s24, 0 }
  0x71   : > { %1069 = dma.done.wait (%p1429_p2), %s250_s10, 512  }
  0x72   : > { %1071 = vsyncadd (%p1429_p2), %s250_s10, 4294966784  ;;  %p1430_p4 = scmp.eq.s32.totalorder %s1174_s18, 0 }
  0x74   : > { %1073 = dma.done.wait (%p1430_p4), [#allocation6], 512   ;;  %p1431_p6 = pmov %p1430_p4 }
  0x75   : > { %s737_s0 = sshll.u32 %s1303_s23, 7 }
  0x76   : > { %1075 = vsyncadd (%p1431_p6), [#allocation6], 4294966784  ;;  %s1319_s22 = scalar_lea.vmem [#allocation7], %s737_s0 }
  0x77   : > { %1077 = dma.done.wait (%p1429_p2), %s250_s10, 2048  }
  0x78   : > { %1079 = vsyncadd (%p1429_p2), %s250_s10, 4294965248  ;;  %v301_v0 = vld [vmem:[%s1319_s22] sm:$0xff]  ;;  %v302_v1 = vld [vmem:[%s1319_s22 + $0x8] sm:$0xff]  ;;  %vm406_vm0 = vcmask 130048   ;;  %s293_s18 = scalar_lea.vmem [#allocation8], %s735_s7  ;;  %s750_s28 = sshll.u32 %s1098_s15, 9 }
  0x79   : > { %v303_v2 = vld [vmem:[%s1319_s22 + $0x10] sm:$0xff]  ;;  %v831_v3 = vpack.c.bf16 %v302_v1, %v301_v0  ;;  %v304_v4 = vld [vmem:[%s1319_s22 + $0x18] sm:$0xff]  ;;  %v305_v6 = vld [vmem:[%s1319_s22 + $0x20] sm:$0xff]  ;;  %s602_s24 = sshll.u32 %s293_s18, 4  ;;  %s1357_s15 = scalar_lea.hbm %s1409_s3, %s750_s28  ;;  %s1352_s24 = int_to_ptr.vmem [resolvable:$true] %s602_s24 }
  0x7a   : > { %v835_v5 = vpack.c.bf16 %v304_v4, %v303_v2  ;;  %v306_v7 = vld [vmem:[%s1319_s22 + $0x28] sm:$0xff]  ;;  %v297_v9 = vld [vmem:[#allocation5] sm:$0xff]  ;;  %v307_v10 = vld [vmem:[%s1319_s22 + $0x30] sm:$0xff]  ;;  %s586_s8 = scalar_lea.sflag [#allocation4], %s1303_s23  ;;  %s1016_s4 = scalar_lea.vmem %s1352_s24, 512 }
  0x7b   : > { %832 = vmatprep.subr.bf16.mxu0 %v831_v3  ;;  %v839_v8 = vpack.c.bf16 %v306_v7, %v305_v6  ;;  %v308_v11 = vld [vmem:[%s1319_s22 + $0x38] sm:$0xff]  ;;  %811 = vmatprep.mubr.f32.mxu0 %v297_v9  ;;  %v309_v13 = vld [vmem:[%s1319_s22 + $0x40] sm:$0xff]  ;;  %v310_v14 = vld [vmem:[%s1319_s22 + $0x48] sm:$0xff]  ;;  %p1017_p7 = scmp.ne.s32.totalorder %s1352_s24, %s1016_s4  ;;  %p1432_p10 = scmp.ne.s32.totalorder %s1421_s25, 0 }
  0x7c   : > { %834 = vmatpush3.bf16.msra.mxu0 %v831_v3  ;;  %v843_v12 = vpack.c.bf16 %v308_v11, %v307_v10  ;;  %v847_v15 = vpack.c.bf16 %v310_v14, %v309_v13  ;;  %v311_v16 = vld [vmem:[%s1319_s22 + $0x50] sm:$0xff]  ;;  %v312_v17 = vld [vmem:[%s1319_s22 + $0x58] sm:$0xff]  ;;  %v313_v19 = vld [vmem:[%s1319_s22 + $0x60] sm:$0xff]  ;;  %s1120_s9 = smov [#allocation8]  }
  0x7d   : > { %836 = vmatprep.subr.bf16.mxu0 %v835_v5  ;;  %v851_v18 = vpack.c.bf16 %v312_v17, %v311_v16  ;;  %v314_v20 = vld [vmem:[%s1319_s22 + $0x68] sm:$0xff]  ;;  %v315_v22 = vld [vmem:[%s1319_s22 + $0x70] sm:$0xff]  ;;  %v316_v23 = vld [vmem:[%s1319_s22 + $0x78] sm:$0xff]  ;;  %p1018_p12 = pnand %p1017_p7, %p1432_p10  ;;  %s1020_s11 = sshll.u32 %s1120_s9, 4  ;;  %s1021_s11 = int_to_ptr.vmem [resolvable:$false] %s1020_s11 }
  0x7e   : > { %v855_v21 = vpack.c.bf16 %v314_v20, %v313_v19  ;;  %v859_v24 = vpack.c.bf16 %v316_v23, %v315_v22  ;;  %v298_v25 = vld [vmem:[#allocation5 + $0x8] sm:$0xff]  ;;  %v299_v26 = vld [vmem:[#allocation5 + $0x10] sm:$0xff]  ;;  %v300_v27 = vld [vmem:[#allocation5 + $0x18] sm:$0xff]  ;;  %s1022_s19 = scalar_lea.vmem %s1021_s11, 1024  ;;  %p1023_p1 = scmp.lt.s32.totalorder %s1352_s24, %s1021_s11 }
  0x7f   : > { %v317_v28 = vld [vmem:[%s1308_s21] sm:$0xff]  ;;  %v318_v34 = vld [vmem:[%s1308_s21 + $0x8] sm:$0xff]  ;;  %v319_v36 = vld [vmem:[%s1308_s21 + $0x10] sm:$0xff]  ;;  %p1019_p13 = pneg %p1018_p12  ;;  %p1024_p5 = scmp.lt.s32.totalorder %s1022_s19, %s1016_s4 }
  0x80   : > { %838 = vmatpush3.bf16.msra.mxu0 %v835_v5  ;;  %821 = vmatprep.mubr.msk.f32.mxu1 %vm406_vm0, %v317_v28  ;;  %v320_v37 = vld [vmem:[%s1308_s21 + $0x18] sm:$0xff] }
  0x81   : > { %840 = vmatprep.subr.bf16.mxu0 %v839_v8  ;;  %p1025_p8 = por %p1024_p5, %p1023_p1 }
  0x83   : > { %p1026_p11 = pnand %p1025_p8, %p1019_p13 }
  0x84   : > { %842 = vmatpush3.bf16.msra.mxu0 %v839_v8 }
  0x85   : > { %844 = vmatprep.subr.bf16.mxu0 %v843_v12 }
  0x88   : > { %846 = vmatpush3.bf16.msra.mxu0 %v843_v12 }
  0x89   : > { %848 = vmatprep.subr.bf16.mxu0 %v847_v15 }
  0x8c   : > { %850 = vmatpush3.bf16.msra.mxu0 %v847_v15 }
  0x8d   : > { %852 = vmatprep.subr.bf16.mxu0 %v851_v18 }
  0x90   : > { %854 = vmatpush3.bf16.msra.mxu0 %v851_v18 }
  0x91   : > { %856 = vmatprep.subr.bf16.mxu0 %v855_v21 }
  0x94   : > { %858 = vmatpush3.bf16.msra.mxu0 %v855_v21 }
  0x95   : > { %860 = vmatprep.subr.bf16.mxu0 %v859_v24 }
  0x98   : > { %862 = vmatpush3.bf16.msra.mxu0 %v859_v24 }
  0x9b   : > { %812 = vmatmul.mubr.f32.vlgmr.msra.gmra.mrb[0].mxu0 %v298_v25 }
  0x9c   : > { %814 = vmatprep.mubr.f32.mxu0 %v299_v26 }
  0x9f   : > { %815 = vmatmul.mubr.f32.gmra.mrb[2].mxu0 %v300_v27 }
 0x16e   : > { %v813_v29 = vpop.f32.mrb[0].mxu0 }
 0x16f   : > { %v387_v30 = vpop.f32.mrb[1].mxu0 }
 0x170   : > { %v863_v31 = vpack.c.bf16 %v813_v29, %v387_v30 }
 0x172   : > { %v816_v32 = vpop.f32.mrb[2].mxu0  ;;  %864 = vmatprep.subr.bf16.mxu1 %v863_v31 }
 0x173   : > { %v397_v33 = vpop.f32.mrb[3].mxu0  ;;  %866 = vmatpush3.bf16.msra.mxu1 %v863_v31 }
 0x174   : > { %v867_v35 = vpack.c.bf16 %v816_v32, %v397_v33 }
 0x176   : > { %822 = vmatmul.mubr.msk.f32.vlgmr.msra.gmra.mrb[0].mxu1 %vm406_vm0, %v318_v34  ;;  %868 = vmatprep.subr.bf16.mxu1 %v867_v35 }
 0x177   : > { %870 = vmatpush3.bf16.msra.mxu1 %v867_v35  ;;  %828 = vmatprep.mubr.msk.f32.mxu1 %vm406_vm0, %v319_v36 }
 0x17a   : > { %829 = vmatmul.mubr.msk.f32.vlgmr.msra.gmra.mrb[2].mxu1 %vm406_vm0, %v320_v37 }
 0x249   : > { %v823_v38 = vpop.f32.mrb[0].mxu1 }
 0x24a   : > { %vm570_vm1 = vcmp.gt.f32.partialorder %v823_v38, 0.0  ;;  %v574_v39 = vmul.f32 0.01, %v823_v38  ;;  %v479_v40 = vpop.f32.mrb[1].mxu1 }
 0x24b   : > { %vm569_vm2 = vcmp.gt.f32.partialorder %v479_v40, 0.0  ;;  %v573_v41 = vmul.f32 0.01, %v479_v40 }
 0x24c   : > { %v578_v42 = vsel %vm570_vm1, %v823_v38, %v574_v39 }
 0x24d   : > { %582 = vst [vmem:[%s293_s18 + $0x8] sm:$0xff] %v578_v42  ;;  %v577_v43 = vsel %vm569_vm2, %v479_v40, %v573_v41  ;;  %v830_v44 = vpop.f32.mrb[2].mxu1 }
 0x24e   : > { %581 = vst [vmem:[%s293_s18] sm:$0xff] %v577_v43  ;;  %vm572_vm3 = vcmp.gt.f32.partialorder %v830_v44, 0.0  ;;  %v576_v45 = vmul.f32 0.01, %v830_v44  ;;  %v560_v46 = vpop.f32.mrb[3].mxu1 }
 0x24f   : > { %vm571_vm4 = vcmp.gt.f32.partialorder %v560_v46, 0.0  ;;  %v575_v47 = vmul.f32 0.01, %v560_v46 }
 0x250   : > { %v580_v48 = vsel %vm572_vm3, %v830_v44, %v576_v45 }
 0x251   : > { %584 = vst [vmem:[%s293_s18 + $0x18] sm:$0xff] %v580_v48  ;;  %v579_v49 = vsel %vm571_vm4, %v560_v46, %v575_v47 }
 0x252   : > { %583 = vst [vmem:[%s293_s18 + $0x10] sm:$0xff] %v579_v49 }
 0x253   : > { %1029 = shalt.err (!%p1026_p11)
}
 0x254   : > { %s1030_s1 = scalar_lea.hbm %s1357_s15, 512  ;;  %s1034_s20 = scalar_lea.hbm %s1409_s3, 1024 }
 0x255   : > { %p1031_p0 = scmp.ne.s32.totalorder %s1357_s15, %s1030_s1  ;;  %p1035_p4 = scmp.lt.u32.totalorder %s1357_s15, %s1409_s3 }
 0x256   : > { %p1036_p6 = scmp.lt.u32.totalorder %s1034_s20, %s1030_s1  ;;  %p1038_p12 = scmp.lt.u32.totalorder %s1030_s1, %s1357_s15 }
 0x257   : > { %p1032_p9 = pnand %p1031_p0, %p1432_p10 }
 0x258   : > { %p1037_p7 = por %p1036_p6, %p1035_p4 }
 0x259   : > { %p1033_p2 = pneg %p1032_p9 }
 0x25a   : > { %p1039_p13 = por %p1038_p12, %p1037_p7 }
 0x25c   : > { %p1040_p1 = pnand %p1039_p13, %p1033_p2 }
 0x25e   : > { %1043 = shalt.err (!%p1040_p1)
}
 0x25f   : > { %s1121_s21 = smov 128   ;;  %s1122_s0 = smov 8  }
 0x260   : > { %886 = dma.vmem_to_hbm [thread:$0]  (%p1432_p10), %s1352_s24, 512, %s1357_s15, %s586_s8, %s1121_s21, %s1121_s21, %s1122_s0  }
 0x261 PF: > { %s617_s22 = sand.u32 1, %s1086_s12   ;;  %p1433_p5 = scmp.ne.s32.totalorder %s1422_s27, 0 }
 0x262   : > { %s618_s18 = scalar_lea.sflag [#allocation4], %s617_s22 }
 0x263   : > { %p893_p8 = pnand %p725_p3, %p1433_p5 }
 0x265   : > { %1081 = dma.done.wait (!%p893_p8), %s618_s18, 512  }
 0x266   : > { %1083 = vsyncadd (!%p893_p8), %s618_s18, 4294966784  ;;  %s20_s17 = sadd.s32 1, %s1106_s17   ;;  %s1434_s25 = sld [smem:[#allocation16_spill]] }
 0x267   : > { %p17_p11 = scmp.ge.s32.totalorder %s20_s17, 4   ;;  %s1435_s12 = smov %s1090_s13 }
 0x268   : > { %s1436_s13 = smov %s1094_s14  ;;  %s1437_s14 = smov %s1205_s26 }
 0x269   : > { %s1438_s15 = smov %s1102_s16  ;;  %19 = sbr.rel (!%p17_p11) target bundleno = 10 (0xa), region = 98 }
 0x26c   : > { %s1439_s16 = smov %s1434_s25 }
 0x270   :  { %623 = vsyncpa [#allocation3], 1 }
 0x271   :  { %625 = vsyncpa [#allocation3 + $0x1], 1 }
 0x272   :  { %626 = vsyncpa [#allocation6], 1 }
 0x273   :  { %627 = vsyncpa [#allocation4], 1 }
 0x274   :  { %629 = vsyncpa [#allocation4 + $0x1], 1 }

</bundles_post_ra>
